<compile_context>
chip_gen: v5e
topology: v5e:2x2
jax: 0.10.0
libtpu: 0.0.40
codegen_flags: <defaults>
</compile_context>

<pallas_src>
import functools

import jax
import jax.numpy as jnp
from jax import lax
from jax.experimental import pallas as pl
from jax.experimental.pallas import tpu as pltpu


def _supcon_kernel(gid_ref, ah_ref, al_ref, ch_ref, cl_ref, o_ref, acc_ref, *,
                   temperature, base_temperature, bsz, n_views, tq):
    """One (loss, row-block) grid step of SupConLoss ('all' mode, labels=None).

    gid_ref : [1, N]   int32 column group ids (col % bsz), grid-constant
    ah_ref  : [tq, D]  bf16 anchor rows, hi half, pre-scaled by 1/temperature
    al_ref  : [tq, D]  bf16 anchor rows, lo half, pre-scaled by 1/temperature
    ch_ref  : [D, N]   bf16 contrast slab, hi half (pre-transposed: MXU NN form)
    cl_ref  : [D, N]   bf16 contrast slab, lo half
    o_ref   : [1, 1]   f32 loss output (written on the last row block)
    acc_ref : [tq, 1]  f32 VMEM per-row loss accumulator
    """
    n = bsz * n_views
    r = pl.program_id(1)

    @pl.when(r == 0)
    def _init():
        acc_ref[...] = jnp.zeros_like(acc_ref)

    fa_hi = ah_ref[...]
    fa_lo = al_ref[...]
    ch = ch_ref[...]
    cl = cl_ref[...]

    # bf16x3 matmul with f32 accumulation.  1/temperature is already folded
    # into the anchor operand, so `sim` is directly the scaled logits.
    sim = jnp.dot(fa_hi, ch, preferred_element_type=jnp.float32)
    sim += jnp.dot(fa_hi, cl, preferred_element_type=jnp.float32)
    sim += jnp.dot(fa_lo, ch, preferred_element_type=jnp.float32)           # [tq, N]

    # Matches the PyTorch reference: the (later-excluded) diagonal participates
    # in the row max (shift-invariant for the final softmax value).
    row_max = jnp.max(sim, axis=1, keepdims=True)                           # [tq, 1]
    logits = sim - row_max

    # Masks from small iotas + the precomputed group-id row: no [tq, N] int32
    # iotas or vector integer-mod per step.
    row0 = r * tq
    row_idx = lax.broadcasted_iota(jnp.int32, (tq, 1), 0) + row0            # [tq, 1]
    col_idx = lax.broadcasted_iota(jnp.int32, (1, n), 1)                    # [1, N]
    gid_row = row_idx % bsz                                                 # [tq, 1]
    gid_col = gid_ref[...]                                                  # [1, N]
    not_diag = row_idx != col_idx                                           # [tq, N]
    pos = jnp.logical_and(gid_row == gid_col, not_diag)                     # [tq, N]

    exp_logits = jnp.where(not_diag, jnp.exp(logits), 0.0)
    denom = jnp.sum(exp_logits, axis=1, keepdims=True)                      # [tq, 1]

    # Every anchor row has exactly (n_views - 1) positives, so the mask row-sum
    # is a compile-time constant and log_prob never materializes:
    #   mean_log_prob_pos = (sum_pos(logits) - npos*log(denom)) / npos
    npos = float(n_views - 1)
    pos_logit_sum = jnp.sum(jnp.where(pos, logits, 0.0), axis=1, keepdims=True)
    mean_log_prob_pos = (pos_logit_sum - npos * jnp.log(denom)) * (1.0 / npos)

    # Per-row accumulate (VPU add); one cross-sublane reduction at finalize.
    acc_ref[...] += (-(temperature / base_temperature)) * mean_log_prob_pos

    @pl.when(r == pl.num_programs(1) - 1)
    def _finalize():
        o_ref[...] = jnp.sum(acc_ref[...], axis=0, keepdims=True) * (1.0 / n)


def _pick_row_tile(n, dim, budget_bytes=20 << 20):
    """Largest legal row tile whose VMEM working set fits the budget."""
    def cost(tq):
        return (8 * n * dim         # double-buffered bf16 hi/lo contrast slab [D, N]
                + 8 * tq * dim      # double-buffered bf16 hi/lo anchor block [tq, D]
                + 8 * tq * n * 4    # ~8 f32/i32/bool [tq, N] temporaries
                + 4 * tq)           # accumulator
    if cost(n) <= budget_bytes:
        return n                    # whole loss in one row step (no per-step overhead)
    divisors = [t for t in range(8, n, 8) if n % t == 0 and cost(t) <= budget_bytes]
    lane_aligned = [t for t in divisors if t % 128 == 0]
    if lane_aligned:
        return max(lane_aligned)    # full MXU passes on v5e (128) / v6e-v7x (256)
    if divisors:
        return max(divisors)
    return n                        # give up on tiling; rely on vmem_limit headroom


def supcon_losses(features, temperature=0.1, base_temperature=0.07, row_tile=None):
    """features: [L, bsz, n_views, D] -> [L] SupCon losses in ONE pallas_call."""
    L, bsz, n_views, dim = features.shape
    if n_views < 2:
        raise ValueError("SupCon needs n_views >= 2 (otherwise no positives)")
    n = bsz * n_views

    # contrast_feature = cat(unbind(features, dim=1), dim=0) per loss -> [L, N, D]
    cf = jnp.transpose(features, (0, 2, 1, 3)).reshape(L, n, dim).astype(jnp.float32)

    # bf16 hi/lo operand split (fused by XLA into the transpose/cast copy above).
    # Anchor side carries the 1/T fold; contrast side is stored pre-transposed
    # [D, N] so the kernel matmul is the canonical (M,K)x(K,N) MXU form.
    # TODO(synk): if the incoming features are already bf16 the *_lo slabs are
    # zero; a bf16-only variant could skip two of the three matmuls and halve
    # the slab DMA.
    a_scaled = cf * (1.0 / float(temperature))
    a_hi = a_scaled.astype(jnp.bfloat16)
    a_lo = (a_scaled - a_hi.astype(jnp.float32)).astype(jnp.bfloat16)
    c_hi = cf.astype(jnp.bfloat16)
    c_lo = (cf - c_hi.astype(jnp.float32)).astype(jnp.bfloat16)
    ct_hi = jnp.transpose(c_hi, (0, 2, 1))      # [L, D, N]
    ct_lo = jnp.transpose(c_lo, (0, 2, 1))

    gid = (jnp.arange(n, dtype=jnp.int32) % bsz).reshape(1, n)

    tq = row_tile if row_tile is not None else _pick_row_tile(n, dim)
    if n % tq != 0:
        raise ValueError(f"row tile {tq} must divide N={n}")
    grid = (L, n // tq)

    kernel = functools.partial(
        _supcon_kernel,
        temperature=float(temperature),
        base_temperature=float(base_temperature),
        bsz=bsz, n_views=n_views, tq=tq)

    # Working set estimate; capped at 48 MiB so it also fits v7x (64 MiB / TC).
    est = 8 * n * dim + 8 * tq * dim + 8 * tq * n * 4 + (1 << 16)
    vmem_limit = int(min(48 * 1024 * 1024, max(32 * 1024 * 1024, 2 * est)))

    out = pl.pallas_call(
        kernel,
        out_shape=jax.ShapeDtypeStruct((L, 1, 1), jnp.float32),
        grid_spec=pltpu.PrefetchScalarGridSpec(
            num_scalar_prefetch=0,
            grid=grid,
            in_specs=[
                pl.BlockSpec((1, n), lambda b, r: (0, 0)),               # gid
                pl.BlockSpec((None, tq, dim), lambda b, r: (b, r, 0)),   # anchor hi
                pl.BlockSpec((None, tq, dim), lambda b, r: (b, r, 0)),   # anchor lo
                pl.BlockSpec((None, dim, n), lambda b, r: (b, 0, 0)),    # contrast hi
                pl.BlockSpec((None, dim, n), lambda b, r: (b, 0, 0)),    # contrast lo
            ],
            out_specs=pl.BlockSpec((None, 1, 1), lambda b, r: (b, 0, 0)),
            scratch_shapes=[pltpu.VMEM((tq, 1), jnp.float32)],
        ),
        # TODO(synk): on v7x, pltpu.CORE_PARALLEL on the L axis would shard the
        # two losses across its 2 TensorCores; "parallel" is kept so the same
        # build runs unchanged on single-TC v5e/v6e parts.
        compiler_params=pltpu.CompilerParams(
            dimension_semantics=("parallel", "arbitrary"),
            vmem_limit_bytes=vmem_limit,
        ),
    )(gid, a_hi, a_lo, ct_hi, ct_lo)
    return out[:, 0, 0]


def _flatten_feature_views(y):
    if y.ndim < 3:
        raise ValueError("`features` needs to be [bsz, n_views, ...]")
    if y.ndim > 3:
        y = y.reshape(y.shape[0], y.shape[1], -1)
    return y


def supcon_loss(features, temperature=0.1, base_temperature=0.07):
    """Single SupCon loss (uses the fused kernel with L=1)."""
    f = _flatten_feature_views(features)
    return supcon_losses(f[None], temperature, base_temperature)[0]


def multi_loss_layer(y1, y2, sigmas_sq, threshold=0.05):
    """Forward pass of MultiLossLayer. Returns (loss, a, b)."""
    f1 = _flatten_feature_views(y1)
    f2 = _flatten_feature_views(y2)
    if f1.shape == f2.shape:
        losses = supcon_losses(jnp.stack([f1, f2], axis=0),
                               temperature=0.1, base_temperature=0.07)
        a, b = losses[0], losses[1]
    else:  # shapes differ -> fall back to two launches
        a = supcon_loss(y1, temperature=0.1, base_temperature=0.07)
        b = supcon_loss(y2, temperature=0.1, base_temperature=0.07)

    # The ParameterList shares one tensor, so only index 0 is ever used.
    s0 = sigmas_sq[0]
    term_a = jnp.where(s0 < threshold, a / (s0 * 2.0) + jnp.log(s0),
                       a / (threshold * 2.0))
    term_b = jnp.where(s0 < threshold, b / (s0 * 2.0) + jnp.log(s0),
                       b / (threshold * 2.0))
    return term_a + term_b, a, b


def _supcon_ref(features, temperature=0.1, base_temperature=0.07):
    """Pure-JAX reference (mirrors the PyTorch SupConLoss, labels=None, 'all')."""
    bsz, n_views, dim = features.shape
    n = bsz * n_views
    cf = jnp.transpose(features, (1, 0, 2)).reshape(n, dim).astype(jnp.float32)
    adc = jnp.matmul(cf, cf.T, precision=lax.Precision.HIGHEST) / temperature
    logits = adc - jnp.max(adc, axis=1, keepdims=True)
    mask = jnp.tile(jnp.eye(bsz, dtype=jnp.float32), (n_views, n_views))
    logits_mask = 1.0 - jnp.eye(n, dtype=jnp.float32)
    mask = mask * logits_mask
    exp_logits = jnp.exp(logits) * logits_mask
    log_prob = logits - jnp.log(exp_logits.sum(1, keepdims=True))
    mlpp = (mask * log_prob).sum(1) / mask.sum(1)
    return (-(temperature / base_temperature) * mlpp).mean()


def _normalize(x):
    return x / jnp.linalg.norm(x, axis=-1, keepdims=True)


if __name__ == "__main__":
    key = jax.random.PRNGKey(0)
    k1, k2, k3, k4 = jax.random.split(key, 4)

    # Small shapes consistent with the module: [bsz, n_views, feat_dim].
    bsz, n_views, dim = 4, 2, 128
    # SupCon expects (roughly) unit-norm embeddings; unnormalized 128-d random
    # vectors underflow every off-diagonal exp(logit) -> NaN in both kernel and
    # reference.  Normalize (standard SupCon/SimCLR usage).
    y1 = _normalize(jax.random.normal(k1, (bsz, n_views, dim), dtype=jnp.float32))
    y2 = _normalize(jax.random.normal(k2, (bsz, n_views, dim), dtype=jnp.float32))

    # Deterministic sigma init: 0.8 * U[0,1) + 0.2, same tensor replicated 3x
    # (nn.ParameterList([nn.Parameter(get_rand())] * 3) shares one parameter).
    s = 0.8 * jax.random.uniform(k3, (), dtype=jnp.float32) + 0.2
    sigmas_sq = jnp.stack([s, s, s])
    threshold = 0.05

    loss, a, b = multi_loss_layer(y1, y2, sigmas_sq, threshold=threshold)
    loss, a, b = jax.block_until_ready((loss, a, b))

    # Correctness vs the pure-JAX f32 reference.
    a_ref = _supcon_ref(y1)
    b_ref = _supcon_ref(y2)
    s0 = sigmas_sq[0]
    loss_ref = (jnp.where(s0 < threshold, a_ref / (s0 * 2.0) + jnp.log(s0),
                          a_ref / (threshold * 2.0)) +
                jnp.where(s0 < threshold, b_ref / (s0 * 2.0) + jnp.log(s0),
                          b_ref / (threshold * 2.0)))
    assert jnp.allclose(a, a_ref, atol=1e-3, rtol=1e-3), (a, a_ref)
    assert jnp.allclose(b, b_ref, atol=1e-3, rtol=1e-3), (b, b_ref)
    assert jnp.allclose(loss, loss_ref, atol=1e-3, rtol=1e-3), (loss, loss_ref)

    # Larger check: N = 48 runs as one row block with the budget-driven picker;
    # also force row_tile=16 to exercise the multi-block accumulation
    # (init / accumulate / finalize) path.
    y3 = _normalize(jax.random.normal(k4, (24, 2, dim), dtype=jnp.float32))
    c_ref = _supcon_ref(y3)
    c_full = jax.block_until_ready(supcon_loss(y3))
    c_tiled = jax.block_until_ready(
        supcon_losses(_flatten_feature_views(y3)[None], row_tile=16)[0])
    assert jnp.allclose(c_full, c_ref, atol=1e-3, rtol=1e-3), (c_full, c_ref)
    assert jnp.allclose(c_tiled, c_ref, atol=1e-3, rtol=1e-3), (c_tiled, c_ref)

    print("KERNEL_OK")
</pallas_src>

<mosaic_0001>
module attributes {stable_mosaic.version = 11 : i64} {
  func.func @_supcon_kernel(%arg0: i32, %arg1: i32, %arg2: memref<1x8xi32, #tpu.memory_space<vmem>>, %arg3: memref<1x8x128xbf16, #tpu.memory_space<vmem>>, %arg4: memref<1x8x128xbf16, #tpu.memory_space<vmem>>, %arg5: memref<1x128x8xbf16, #tpu.memory_space<vmem>>, %arg6: memref<1x128x8xbf16, #tpu.memory_space<vmem>>, %arg7: memref<1x1x1xf32, #tpu.memory_space<vmem>>, %arg8: memref<8x1xf32, #tpu.memory_space<vmem>>) attributes {dimension_semantics = [#tpu.dimension_semantics<parallel>, #tpu.dimension_semantics<arbitrary>], iteration_bounds = array<i64: 2, 1>, scalar_prefetch = 0 : i64, scratch_operands = 1 : i64, tpu.core_type = #tpu.core_type<tc>, window_params = [{pipeline_mode = #tpu.pipeline_mode<synchronous>, transform_indices = @transform_0, window_bounds = array<i64: 1, 8>}, {transform_indices = @transform_1, window_bounds = array<i64: 1, 8, 128>}, {transform_indices = @transform_2, window_bounds = array<i64: 1, 8, 128>}, {transform_indices = @transform_3, window_bounds = array<i64: 1, 128, 8>}, {transform_indices = @transform_4, window_bounds = array<i64: 1, 128, 8>}, {transform_indices = @transform_5, window_bounds = array<i64: 1, 1, 1>}]} {
    %c0_i32 = arith.constant 0 : i32
    %0 = arith.cmpi eq, %arg1, %c0_i32 : i32
    %1 = arith.extui %0 : i1 to i32
    %c0_i32_0 = arith.constant 0 : i32
    %2 = arith.cmpi ne, %1, %c0_i32_0 : i32
    scf.if %2 {
      %cst_34 = arith.constant 0.000000e+00 : f32
      %72 = vector.broadcast %cst_34 : f32 to vector<8x1xf32>
      %c0_35 = arith.constant 0 : index
      %c0_36 = arith.constant 0 : index
      %73 = vector.load %arg8[%c0_35, %c0_36] : memref<8x1xf32, #tpu.memory_space<vmem>>, vector<8x1xf32>
      tpu.vector_store %arg8[%c0_35, %c0_36], %72 {strides = array<i32>} : memref<8x1xf32, #tpu.memory_space<vmem>>, vector<8x1xf32>,
    } else {
    }
    %c0 = arith.constant 0 : index
    %c0_1 = arith.constant 0 : index
    %c0_2 = arith.constant 0 : index
    %3 = vector.load %arg3[%c0, %c0_1, %c0_2] : memref<1x8x128xbf16, #tpu.memory_space<vmem>>, vector<1x8x128xbf16>
    %4 = vector.shape_cast %3 : vector<1x8x128xbf16> to vector<8x128xbf16>
    %c0_3 = arith.constant 0 : index
    %c0_4 = arith.constant 0 : index
    %c0_5 = arith.constant 0 : index
    %5 = vector.load %arg4[%c0_3, %c0_4, %c0_5] : memref<1x8x128xbf16, #tpu.memory_space<vmem>>, vector<1x8x128xbf16>
    %6 = vector.shape_cast %5 : vector<1x8x128xbf16> to vector<8x128xbf16>
    %c0_6 = arith.constant 0 : index
    %c0_7 = arith.constant 0 : index
    %c0_8 = arith.constant 0 : index
    %7 = vector.load %arg5[%c0_6, %c0_7, %c0_8] : memref<1x128x8xbf16, #tpu.memory_space<vmem>>, vector<1x128x8xbf16>
    %8 = vector.shape_cast %7 : vector<1x128x8xbf16> to vector<128x8xbf16>
    %c0_9 = arith.constant 0 : index
    %c0_10 = arith.constant 0 : index
    %c0_11 = arith.constant 0 : index
    %9 = vector.load %arg6[%c0_9, %c0_10, %c0_11] : memref<1x128x8xbf16, #tpu.memory_space<vmem>>, vector<1x128x8xbf16>
    %10 = vector.shape_cast %9 : vector<1x128x8xbf16> to vector<128x8xbf16>
    %cst = arith.constant dense<0.000000e+00> : vector<8x8xf32>
    %11 = tpu.matmul %4, %8, %cst {dimension_numbers = #tpu.dot_dimension_numbers<[1], [0], [0], [1], [0, 0, 1, 1], [], []>} : vector<8x128xbf16>, vector<128x8xbf16>, vector<8x8xf32> -> vector<8x8xf32>
    %cst_12 = arith.constant dense<0.000000e+00> : vector<8x8xf32>
    %12 = tpu.matmul %4, %10, %cst_12 {dimension_numbers = #tpu.dot_dimension_numbers<[1], [0], [0], [1], [0, 0, 1, 1], [], []>} : vector<8x128xbf16>, vector<128x8xbf16>, vector<8x8xf32> -> vector<8x8xf32>
    %13 = arith.addf %11, %12 : vector<8x8xf32>
    %cst_13 = arith.constant dense<0.000000e+00> : vector<8x8xf32>
    %14 = tpu.matmul %6, %8, %cst_13 {dimension_numbers = #tpu.dot_dimension_numbers<[1], [0], [0], [1], [0, 0, 1, 1], [], []>} : vector<8x128xbf16>, vector<128x8xbf16>, vector<8x8xf32> -> vector<8x8xf32>
    %15 = arith.addf %13, %14 : vector<8x8xf32>
    %cst_14 = arith.constant dense<0xFF800000> : vector<8xf32>
    %16 = vector.multi_reduction <maximumf>, %15, %cst_14 [1] : vector<8x8xf32> to vector<8xf32>
    %17 = vector.shape_cast %16 : vector<8xf32> to vector<8x1xf32>
    %18 = vector.broadcast %17 : vector<8x1xf32> to vector<8x8xf32>
    %19 = arith.subf %15, %18 : vector<8x8xf32>
    %c8_i32 = arith.constant 8 : i32
    %20 = arith.muli %arg1, %c8_i32 : i32
    %21 = tpu.iota {dimensions = array<i32: 0>} : vector<8x1xi32>
    %22 = vector.broadcast %20 : i32 to vector<8x1xi32>
    %23 = arith.addi %21, %22 : vector<8x1xi32>
    %24 = tpu.iota {dimensions = array<i32: 1>} : vector<1x8xi32>
    %c4_i32 = arith.constant 4 : i32
    %c0_i32_15 = arith.constant 0 : i32
    %25 = arith.cmpi eq, %c4_i32, %c0_i32_15 : i32
    %c1_i32 = arith.constant 1 : i32
    %26 = arith.select %25, %c1_i32, %c4_i32 : i32
    %27 = vector.broadcast %26 : i32 to vector<8x1xi32>
    %28 = arith.remsi %23, %27 : vector<8x1xi32>
    %c0_i32_16 = arith.constant 0 : i32
    %29 = vector.broadcast %c0_i32_16 : i32 to vector<8x1xi32>
    %30 = arith.cmpi ne, %28, %29 : vector<8x1xi32>
    %c0_i32_17 = arith.constant 0 : i32
    %31 = vector.broadcast %c0_i32_17 : i32 to vector<8x1xi32>
    %32 = arith.cmpi slt, %28, %31 : vector<8x1xi32>
    %c0_i32_18 = arith.constant 0 : i32
    %33 = arith.cmpi slt, %26, %c0_i32_18 : i32
    %34 = vector.broadcast %33 : i1 to vector<8x1xi1>
    %35 = vector.broadcast %34 : vector<8x1xi1> to vector<8x1xi1>
    %36 = arith.xori %32, %35 : vector<8x1xi1>
    %37 = arith.andi %36, %30 : vector<8x1xi1>
    %38 = vector.broadcast %26 : i32 to vector<8x1xi32>
    %39 = arith.addi %28, %38 : vector<8x1xi32>
    %40 = arith.select %37, %39, %28 : vector<8x1xi1>, vector<8x1xi32>
    %c0_19 = arith.constant 0 : index
    %c0_20 = arith.constant 0 : index
    %41 = vector.load %arg2[%c0_19, %c0_20] : memref<1x8xi32, #tpu.memory_space<vmem>>, vector<1x8xi32>
    %42 = vector.broadcast %23 : vector<8x1xi32> to vector<8x8xi32>
    %43 = vector.broadcast %24 : vector<1x8xi32> to vector<8x8xi32>
    %44 = arith.cmpi ne, %42, %43 : vector<8x8xi32>
    %45 = vector.broadcast %40 : vector<8x1xi32> to vector<8x8xi32>
    %46 = vector.broadcast %41 : vector<1x8xi32> to vector<8x8xi32>
    %47 = arith.cmpi eq, %45, %46 : vector<8x8xi32>
    %48 = arith.andi %47, %44 : vector<8x8xi1>
    %49 = math.exp %19 : vector<8x8xf32>
    %cst_21 = arith.constant 0.000000e+00 : f32
    %50 = vector.broadcast %cst_21 : f32 to vector<8x8xf32>
    %51 = arith.select %44, %49, %50 : vector<8x8xi1>, vector<8x8xf32>
    %cst_22 = arith.constant dense<0.000000e+00> : vector<8xf32>
    %52 = vector.multi_reduction <add>, %51, %cst_22 [1] : vector<8x8xf32> to vector<8xf32>
    %53 = vector.shape_cast %52 : vector<8xf32> to vector<8x1xf32>
    %cst_23 = arith.constant 0.000000e+00 : f32
    %54 = vector.broadcast %cst_23 : f32 to vector<8x8xf32>
    %55 = arith.select %48, %19, %54 : vector<8x8xi1>, vector<8x8xf32>
    %cst_24 = arith.constant dense<0.000000e+00> : vector<8xf32>
    %56 = vector.multi_reduction <add>, %55, %cst_24 [1] : vector<8x8xf32> to vector<8xf32>
    %57 = vector.shape_cast %56 : vector<8xf32> to vector<8x1xf32>
    %58 = math.log %53 : vector<8x1xf32>
    %cst_25 = arith.constant 1.000000e+00 : f32
    %59 = vector.broadcast %cst_25 : f32 to vector<8x1xf32>
    %60 = arith.mulf %59, %58 : vector<8x1xf32>
    %61 = arith.subf %57, %60 : vector<8x1xf32>
    %cst_26 = arith.constant 1.000000e+00 : f32
    %62 = vector.broadcast %cst_26 : f32 to vector<8x1xf32>
    %63 = arith.mulf %61, %62 : vector<8x1xf32>
    %c0_27 = arith.constant 0 : index
    %c0_28 = arith.constant 0 : index
    %64 = vector.load %arg8[%c0_27, %c0_28] : memref<8x1xf32, #tpu.memory_space<vmem>>, vector<8x1xf32>
    %cst_29 = arith.constant -1.42857146 : f32
    %65 = vector.broadcast %cst_29 : f32 to vector<8x1xf32>
    %66 = arith.mulf %65, %63 : vector<8x1xf32>
    %67 = arith.addf %64, %66 : vector<8x1xf32>
    %c0_30 = arith.constant 0 : index
    %c0_31 = arith.constant 0 : index
    %68 = vector.load %arg8[%c0_30, %c0_31] : memref<8x1xf32, #tpu.memory_space<vmem>>, vector<8x1xf32>
    tpu.vector_store %arg8[%c0_30, %c0_31], %67 {strides = array<i32>} : memref<8x1xf32, #tpu.memory_space<vmem>>, vector<8x1xf32>,
    %c0_i32_32 = arith.constant 0 : i32
    %69 = arith.cmpi eq, %arg1, %c0_i32_32 : i32
    %70 = arith.extui %69 : i1 to i32
    %c0_i32_33 = arith.constant 0 : i32
    %71 = arith.cmpi ne, %70, %c0_i32_33 : i32
    scf.if %71 {
      %c0_34 = arith.constant 0 : index
      %c0_35 = arith.constant 0 : index
      %72 = vector.load %arg8[%c0_34, %c0_35] : memref<8x1xf32, #tpu.memory_space<vmem>>, vector<8x1xf32>
      %cst_36 = arith.constant dense<0.000000e+00> : vector<1xf32>
      %73 = vector.multi_reduction <add>, %72, %cst_36 [0] : vector<8x1xf32> to vector<1xf32>
      %74 = vector.shape_cast %73 : vector<1xf32> to vector<1x1xf32>
      %cst_37 = arith.constant 1.250000e-01 : f32
      %75 = vector.broadcast %cst_37 : f32 to vector<1x1xf32>
      %76 = arith.mulf %74, %75 : vector<1x1xf32>
      %c0_38 = arith.constant 0 : index
      %c0_39 = arith.constant 0 : index
      %c0_40 = arith.constant 0 : index
      %77 = vector.load %arg7[%c0_38, %c0_39, %c0_40] : memref<1x1x1xf32, #tpu.memory_space<vmem>>, vector<1x1x1xf32>
      %78 = vector.shape_cast %77 : vector<1x1x1xf32> to vector<1x1xf32>
      %79 = vector.shape_cast %76 : vector<1x1xf32> to vector<1x1x1xf32>
      tpu.vector_store %arg7[%c0_38, %c0_39, %c0_40], %79 {strides = array<i32>} : memref<1x1x1xf32, #tpu.memory_space<vmem>>, vector<1x1x1xf32>,
    } else {
    }
    return
  }
  func.func @transform_0(%arg0: i32, %arg1: i32) -> (i32, i32) {
    %c0_i32 = arith.constant 0 : i32
    %c0_i32_0 = arith.constant 0 : i32
    %c0_i32_1 = arith.constant 0 : i32
    return %c0_i32, %c0_i32_0 : i32, i32
  }
  func.func @transform_1(%arg0: i32, %arg1: i32) -> (i32, i32, i32) {
    %c0_i32 = arith.constant 0 : i32
    %c0_i32_0 = arith.constant 0 : i32
    return %arg0, %arg1, %c0_i32 : i32, i32, i32
  }
  func.func @transform_2(%arg0: i32, %arg1: i32) -> (i32, i32, i32) {
    %c0_i32 = arith.constant 0 : i32
    %c0_i32_0 = arith.constant 0 : i32
    return %arg0, %arg1, %c0_i32 : i32, i32, i32
  }
  func.func @transform_3(%arg0: i32, %arg1: i32) -> (i32, i32, i32) {
    %c0_i32 = arith.constant 0 : i32
    %c0_i32_0 = arith.constant 0 : i32
    %c0_i32_1 = arith.constant 0 : i32
    return %arg0, %c0_i32, %c0_i32_0 : i32, i32, i32
  }
  func.func @transform_4(%arg0: i32, %arg1: i32) -> (i32, i32, i32) {
    %c0_i32 = arith.constant 0 : i32
    %c0_i32_0 = arith.constant 0 : i32
    %c0_i32_1 = arith.constant 0 : i32
    return %arg0, %c0_i32, %c0_i32_0 : i32, i32, i32
  }
  func.func @transform_5(%arg0: i32, %arg1: i32) -> (i32, i32, i32) {
    %c0_i32 = arith.constant 0 : i32
    %c0_i32_0 = arith.constant 0 : i32
    %c0_i32_1 = arith.constant 0 : i32
    return %arg0, %c0_i32, %c0_i32_0 : i32, i32, i32
  }
}

</mosaic_0001>

<bundles_post_ra>
// kernel: tpu_custom_call.1
= control target key start
LH: loop header
LB: loop body
LE: loop exit
PB: predicated region body
PF: predicated region fallthrough
CT: control target
= control target key end

     0   :  { %s823_s18 = smov 0   ;;  %s825_s19 = smov 0   ;;  %s896_s0 = inlined_call_operand.vmem [shape: s32[1,8], index: 0, kind: input, shape index: {}]   ;;  %s897_s1 = inlined_call_operand.vmem [shape: bf16[2,8,128], index: 1, kind: input, shape index: {}]   ;;  %s898_s2 = inlined_call_operand.vmem [shape: bf16[2,8,128], index: 2, kind: input, shape index: {}]   ;;  %s899_s3 = inlined_call_operand.vmem [shape: bf16[2,128,8], index: 3, kind: input, shape index: {}]   ;;  %s900_s4 = inlined_call_operand.vmem [shape: bf16[2,128,8], index: 4, kind: input, shape index: {}]   ;;  %s901_s5 = inlined_call_operand.vmem [shape: f32[2,1,1], index: 5, kind: output, shape index: {}]  }
   0x1   :  { %s827_s20 = smov 0  }
   0x2 LB: > { %s27_s21 = sadd.s32 1, %s786_s19  ;;  %p647_p0 = scmp.ge.s32.totalorder %s790_s20, 1  ;;  %s790_s20 = sphi %s827_s20, %s15_s20   ;;  %s786_s19 = sphi %s825_s19, %s903_s19   ;;  %s782_s18 = sphi %s823_s18, %s902_s18  }
   0x3   : > { %p29_p1 = scmp.ge.s32.totalorder %s27_s21, 2  ;;  %p237_p2 = scmp.lt.s32.totalorder %s790_s20, 3 }
   0x5   : > { %s905_s21 = smov (%p29_p1, %s27_s21), 0  ;;  %p238_p3 = pnand %p647_p0, %p237_p2 }
   0x6   : > { %p282_p4 = scmp.lt.s32.totalorder (!%p238_p3), %s782_s18, 1 }
   0x7   : > { %241 = sbr.rel (%p238_p3) target bundleno = 467 (0x1d3), region = 40 }
   0xc   : > { %s907_s18 = smov (!%p282_p4, %s782_s18), 1  ;;  %vm485_vm0 = vcmask 64512   ;;  %v491_v27 = vlaneseq  ;;  %v763_v31 = vld [vmem:[%s896_s0] ss:$0 sm:$0xff]  ;;  %vm313_vm4 = vcmask 7168   ;;  %v792_v40 = vmov 0.0  }
   0xd   : > { %s720_s22 = sshll.u32 %s907_s18, 6  ;;  %s648_s29 = sshll.u32 %s907_s18, 2  ;;  %314 = vst.msk [vmem:[#allocation2] sm:$0xff] %vm313_vm4, %v792_v40  ;;  %vm544_vm5 = vcmask 0  }
   0xe   : > { %s847_s25 = scalar_lea.vmem %s900_s4, %s720_s22  ;;  %s852_s28 = scalar_lea.vmem %s899_s3, %s720_s22  ;;  %v492_v28 = vshrl.u32 %v491_v27, 7  ;;  %v496_v29 = vand.u32 127, %v491_v27 }
   0xf   : > { %v737_v0 = vld [vmem:[%s847_s25 + $0x38] sm:$0xff]  ;;  %v736_v2 = vld [vmem:[%s847_s25 + $0x30] sm:$0xff]  ;;  %v735_v4 = vld [vmem:[%s847_s25 + $0x28] sm:$0xff]  ;;  %s288_s7 = scalar_lea.vmem %s897_s1, %s648_s29  ;;  %s295_s10 = scalar_lea.vmem %s898_s2, %s648_s29 }
  0x10   : > { %v729_v1 = vld [vmem:[%s852_s28 + $0x38] sm:$0xff]  ;;  %397 = vmatpush.bf16.msra.mxu0 %v737_v0  ;;  %v728_v3 = vld [vmem:[%s852_s28 + $0x30] sm:$0xff]  ;;  %v727_v5 = vld [vmem:[%s852_s28 + $0x28] sm:$0xff]  ;;  %v501_v30 = vand.u32 3, %v492_v28  ;;  %vm510_vm1 = vcmp.ne.s32.totalorder %v492_v28, %v496_v29  ;;  %s308_s15 = scalar_lea.vmem %s901_s5, %s907_s18 }
  0x11   : > { %458 = vmatpush.bf16.msra.mxu1 %v729_v1  ;;  %471 = vmatpush.bf16.msra.mxu2 %v729_v1  ;;  %v734_v6 = vld [vmem:[%s847_s25 + $0x20] sm:$0xff]  ;;  %v733_v8 = vld [vmem:[%s847_s25 + $0x18] sm:$0xff]  ;;  %v732_v10 = vld [vmem:[%s847_s25 + $0x10] sm:$0xff] }
  0x12   : > { %v726_v7 = vld [vmem:[%s852_s28 + $0x20] sm:$0xff]  ;;  %v725_v9 = vld [vmem:[%s852_s28 + $0x18] sm:$0xff]  ;;  %v724_v11 = vld [vmem:[%s852_s28 + $0x10] sm:$0xff]  ;;  %vm512_vm2 = vcmp.eq.s32.totalorder %v501_v30, %v763_v31 }
  0x13   : > { %v731_v12 = vld [vmem:[%s847_s25 + $0x8] sm:$0xff]  ;;  %v730_v14 = vld [vmem:[%s847_s25] sm:$0xff]  ;;  %vm513_vm3 = vmand %vm512_vm2, %vm510_vm1 }
  0x14   : > { %398 = vmatpush.bf16.msra.mxu0 %v736_v2  ;;  %v723_v13 = vld [vmem:[%s852_s28 + $0x8] sm:$0xff]  ;;  %v722_v15 = vld [vmem:[%s852_s28] sm:$0xff] }
  0x15   : > { %459 = vmatpush.bf16.msra.mxu1 %v728_v3  ;;  %472 = vmatpush.bf16.msra.mxu2 %v728_v3  ;;  %v315_v16 = vld [vmem:[%s288_s7] sm:$0xf] }
  0x16   : > { %v316_v17 = vld [vmem:[%s295_s10] sm:$0xf] }
  0x17   : > { %v527_v46 = vld [vmem:[#allocation2] sm:$0xff] }
  0x18   : > { %399 = vmatpush.bf16.msra.mxu0 %v735_v4 }
  0x19   : > { %460 = vmatpush.bf16.msra.mxu1 %v727_v5  ;;  %473 = vmatpush.bf16.msra.mxu2 %v727_v5 }
  0x1c   : > { %400 = vmatpush.bf16.msra.mxu0 %v734_v6 }
  0x1d   : > { %461 = vmatpush.bf16.msra.mxu1 %v726_v7  ;;  %474 = vmatpush.bf16.msra.mxu2 %v726_v7 }
  0x20   : > { %401 = vmatpush.bf16.msra.mxu0 %v733_v8 }
  0x21   : > { %462 = vmatpush.bf16.msra.mxu1 %v725_v9  ;;  %475 = vmatpush.bf16.msra.mxu2 %v725_v9 }
  0x24   : > { %402 = vmatpush.bf16.msra.mxu0 %v732_v10 }
  0x25   : > { %463 = vmatpush.bf16.msra.mxu1 %v724_v11  ;;  %476 = vmatpush.bf16.msra.mxu2 %v724_v11 }
  0x28   : > { %403 = vmatpush.bf16.msra.mxu0 %v731_v12 }
  0x29   : > { %464 = vmatpush.bf16.msra.mxu1 %v723_v13  ;;  %477 = vmatpush.bf16.msra.mxu2 %v723_v13 }
  0x2c   : > { %404 = vmatpush.bf16.msra.mxu0 %v730_v14 }
  0x2d   : > { %465 = vmatpush.bf16.msra.mxu1 %v722_v15  ;;  %478 = vmatpush.bf16.msra.mxu2 %v722_v15 }
  0x2f   : > { %405 = vmatmul.bf16.vlgmr.msra.gmra.mxu0 %v315_v16 }
  0x30   : > { %466 = vmatmul.bf16.vlgmr.msra.gmra.mxu1 %v315_v16  ;;  %479 = vmatmul.bf16.vlgmr.msra.gmra.mxu2 %v316_v17 }
  0xac   : > { %v406_v18 = vpop.f32.mrf.mxu0 }
  0xad   : > { %v467_v19 = vpop.f32.mrf.mxu1 }
  0xae   : > { %v468_v20 = vadd.f32 %v467_v19, %v406_v18 }
  0xb3   : > { %v480_v21 = vpop.f32.mrf.mxu2 }
  0xb4   : > { %v484_v22 = vadd.f32 %v480_v21, %v468_v20  ;;  %v408_v23 = vpop.f32.mrf.mxu0 }
  0xb5   : > { %v469_v24 = vpop.f32.mrf.mxu1 }
  0xb6   : > { %v486_v25 = vsel %vm485_vm0, %v484_v22, -inf }
  0xb7   : > { %487 = vmax.xlane.f32.xlu0 %v486_v25 }
  0xbb   : > { %v482_v26 = vpop.f32.mrf.mxu2 }
 0x12a   : > { %v488_v32 = vpop.xlane.xlu0 %487 }
 0x12b   : > { %v489_v33 = vsub.f32 %v484_v22, %v488_v32 }
 0x12d   : > { %v514_v34 = vmul.f32 1.442695, %v489_v33  ;;  %v520_v35 = vsel %vm513_vm3, %v489_v33, 0.0 }
 0x12e   : > { %v521_v36 = vsel %vm485_vm0, %v520_v35, 0.0 }
 0x12f   : > { %764 = vpow2.f32 %v514_v34  ;;  %522 = vadd.xlane.f32.xlu1 %v521_v36 }
 0x135   : > { %v765_v37 = vpop.eup %764 }
 0x136   : > { %v516_v38 = vsel %vm510_vm1, %v765_v37, 0.0 }
 0x137   : > { %v517_v39 = vsel %vm485_vm0, %v516_v38, 0.0 }
 0x138   : > { %518 = vadd.xlane.f32.xlu0 %v517_v39 }
 0x1a2   : > { %v523_v44 = vpop.xlane.xlu1 %522 }
 0x1ab   : > { %v519_v41 = vpop.xlane.xlu0 %518 }
 0x1ac   : > { %766 = vlog2.f32 %v519_v41 }
 0x1b2   : > { %v767_v42 = vpop.eup %766 }
 0x1b3   : > { %v525_v43 = vmul.f32 0.6931472, %v767_v42 }
 0x1b5   : > { %v526_v45 = vsub.f32 %v523_v44, %v525_v43 }
 0x1b7   : > { %v528_v47 = vmul.f32 -1.4285715, %v526_v45 }
 0x1b9   : > { %v529_v48 = vadd.f32 %v528_v47, %v527_v46 }
 0x1bb   : > { %531 = vst.msk [vmem:[#allocation2] sm:$0xff] %vm313_vm4, %v529_v48 }
 0x1c2   : > { %v535_v49 = vld [vmem:[#allocation2] sm:$0xff] }
 0x1c3   : > { %v536_v50 = vsel %vm313_vm4, %v535_v49, 0.0 }
 0x1c4   : > { %v537_v51 = vrot.slane %v536_v50, 4 }
 0x1c6   : > { %v538_v52 = vadd.f32 %v537_v51, %v536_v50 }
 0x1c8   : > { %v539_v53 = vrot.slane %v538_v52, 2 }
 0x1ca   : > { %v540_v54 = vadd.f32 %v539_v53, %v538_v52 }
 0x1cc   : > { %v541_v55 = vrot.slane %v540_v54, 1 }
 0x1ce   : > { %v542_v56 = vadd.f32 %v541_v55, %v540_v54 }
 0x1d0   : > { %v543_v57 = vmul.f32 0.125, %v542_v56 }
 0x1d2   : > { %545 = vst.msk [vmem:[%s308_s15] sm:$0x1] %vm544_vm5, %v543_v57 }
 0x1d3 PF: > { %s15_s20 = sadd.s32 1, %s790_s20   ;;  %s902_s18 = smov %s786_s19 }
 0x1d4   : > { %p12_p5 = scmp.ge.s32.totalorder %s15_s20, 4   ;;  %s903_s19 = smov %s905_s21 }
 0x1d6   :  { %14 = sbr.rel (!%p12_p5) target bundleno = 2 (0x2), region = 87 }

</bundles_post_ra>
